<compile_context>
chip_gen: v5e
topology: v5e:2x2
jax: 0.10.0
libtpu: 0.0.40
codegen_flags: <defaults>
</compile_context>

<pallas_src>
import jax
import jax.numpy as jnp
from jax.experimental import pallas as pl
from jax.experimental.pallas import tpu as pltpu


def _round_up(x, m):
    return ((x + m - 1) // m) * m


def _norm_rows_kernel(x_ref, sb_ref, o_ref):
    # x_ref: (TR, TC); sb_ref: (TR, 2) f32 with [:,0]=scale=1/std, [:,1]=bias=-mean/std.
    # Pure FMA stream in f32, lane-broadcast of the per-row constants.
    x = x_ref[...].astype(jnp.float32)
    sb = sb_ref[...]
    o_ref[...] = (x * sb[:, 0:1] + sb[:, 1:2]).astype(o_ref.dtype)


def _norm_cols_kernel(x_ref, sb_ref, o_ref):
    # x_ref: (TRn, TCc); sb_ref: (2, TCc) f32 with row0=scale, row1=bias
    # (sublane broadcast of per-column constants for the tiny-HW layout).
    x = x_ref[...].astype(jnp.float32)
    sb = sb_ref[...]
    o_ref[...] = (x * sb[0:1, :] + sb[1:2, :]).astype(o_ref.dtype)


def _target_block_bytes():
    # Bigger blocks amortize the ~0.35us per-grid-step overhead on v6e/v7x;
    # stay at 2 MiB on v5e (16 MiB scoped-VMEM default) and unknown chips.
    try:
        kind = jax.devices()[0].device_kind.lower()
    except Exception:
        return 2 * 1024 * 1024
    if "v6" in kind or "v7" in kind or "7x" in kind:
        return 4 * 1024 * 1024
    return 2 * 1024 * 1024


def normalization(img, mean, std):
    """(img - mean[None,:,None,None]) / std[None,:,None,None] for an NCHW img."""
    N, C, H, W = img.shape
    HW = H * W
    in_dtype = img.dtype
    itemsize = jnp.dtype(in_dtype).itemsize
    # PyTorch promotes integer images to float when subtracting a float mean.
    out_dtype = jnp.float32 if jnp.issubdtype(in_dtype, jnp.integer) else in_dtype
    out_itemsize = jnp.dtype(out_dtype).itemsize

    mean_f32 = jnp.asarray(mean, jnp.float32).reshape(-1)
    std_f32 = jnp.asarray(std, jnp.float32).reshape(-1)
    if mean_f32.shape[0] != C or std_f32.shape[0] != C:
        raise ValueError(
            f"mean/std must have length C={C}; got "
            f"{mean_f32.shape[0]} / {std_f32.shape[0]}")

    # Fold into a fused multiply-add: y = x * (1/std) + (-mean/std).
    scale_c = 1.0 / std_f32
    bias_c = -mean_f32 * scale_c

    sublane = {1: 32, 2: 16, 4: 8}.get(itemsize, 8)
    target_bytes = _target_block_bytes()

    if HW >= 128:
        # Rows = N*C on the sublane axis, spatial on the lane axis.
        R = N * C
        x2 = img.reshape(R, HW)
        sb = jnp.stack([jnp.tile(scale_c, N), jnp.tile(bias_c, N)], axis=1)  # (R, 2)

        TR = min(_round_up(R, sublane), 256)
        tc_cap = max(128, ((target_bytes // (TR * itemsize)) // 128) * 128)
        TC = min(_round_up(HW, 128), tc_cap)
        # Megacore occupancy: if the row axis has a single tile, keep >=2
        # (ideally up to 8) column tiles so the "parallel" axis shards across TCs.
        if pl.cdiv(R, TR) == 1:
            groups = pl.cdiv(HW, 128)
            desired = min(8, groups)
            if desired > 1:
                TC = min(TC, max(128, pl.cdiv(groups, desired) * 128))

        grid = (pl.cdiv(R, TR), pl.cdiv(HW, TC))
        kernel = _norm_rows_kernel
        in_specs = [
            pl.BlockSpec((TR, TC), lambda i, j: (i, j)),
            pl.BlockSpec((TR, 2), lambda i, j: (i, 0)),
        ]
        out_specs = pl.BlockSpec((TR, TC), lambda i, j: (i, j))
        out_shape2 = (R, HW)
        sb_block_bytes = TR * 128 * 4
    else:
        # Tiny spatial maps: keep lanes dense by flattening channels into the
        # lane axis: (N, C*HW) with a (2, C*HW) scale/bias table.
        CHW = C * HW
        x2 = img.reshape(N, CHW)
        sb = jnp.stack([jnp.repeat(scale_c, HW), jnp.repeat(bias_c, HW)], axis=0)  # (2, CHW)

        TR = min(_round_up(N, sublane), 256)
        if TR * _round_up(CHW, 128) * itemsize <= target_bytes:
            TC = CHW
        else:
            TC = max(128, ((target_bytes // (TR * itemsize)) // 128) * 128)

        grid = (pl.cdiv(N, TR), pl.cdiv(CHW, TC))
        kernel = _norm_cols_kernel
        in_specs = [
            pl.BlockSpec((TR, TC), lambda i, j: (i, j)),
            pl.BlockSpec((2, TC), lambda i, j: (0, j)),
        ]
        out_specs = pl.BlockSpec((TR, TC), lambda i, j: (i, j))
        out_shape2 = (N, CHW)
        sb_block_bytes = 8 * _round_up(TC, 128) * 4

    # Explicit scoped-VMEM budget: double-buffered in+out blocks + scale/bias + margin.
    lanes = _round_up(TC, 128)
    vmem_needed = 2 * (TR * lanes * itemsize + TR * lanes * out_itemsize + sb_block_bytes)
    vmem_limit = int(min(48 << 20, max(16 << 20, vmem_needed + (4 << 20))))

    total = img.size
    cost = pl.CostEstimate(
        flops=2 * total,
        transcendentals=0,
        bytes_accessed=total * (itemsize + out_itemsize) + sb.size * 4,
    )

    out2 = pl.pallas_call(
        kernel,
        out_shape=jax.ShapeDtypeStruct(out_shape2, out_dtype),
        grid=grid,
        in_specs=in_specs,
        out_specs=out_specs,
        compiler_params=pltpu.CompilerParams(
            dimension_semantics=("parallel", "parallel"),
            vmem_limit_bytes=vmem_limit,
        ),
        cost_estimate=cost,
    )(x2, sb)

    return out2.reshape(N, C, H, W)


if __name__ == "__main__":
    key = jax.random.PRNGKey(0)

    # Deterministic per-channel mean/std (ImageNet-like, padded to C=4).
    mean = jnp.array([0.485, 0.456, 0.406, 0.500], dtype=jnp.float32)
    std = jnp.array([0.229, 0.224, 0.225, 0.250], dtype=jnp.float32)

    def ref_norm(x, m, s):
        c = x.shape[1]
        return (x - m.reshape(1, c, 1, 1)) / s.reshape(1, c, 1, 1)

    k0, k1, k2 = jax.random.split(key, 3)

    # Primary case: lane-aligned spatial axis (HW = 256).
    img = jax.random.uniform(k0, (2, 4, 16, 16), dtype=jnp.float32)
    out = jax.block_until_ready(normalization(img, mean, std))
    assert out.shape == img.shape and out.dtype == img.dtype
    assert jnp.allclose(out, ref_norm(img, mean, std), rtol=1e-5, atol=1e-5)

    # Ragged spatial axis (HW = 144): last column block masked, no host pad/slice.
    img_r = jax.random.uniform(k1, (2, 4, 16, 9), dtype=jnp.float32)
    out_r = jax.block_until_ready(normalization(img_r, mean, std))
    assert jnp.allclose(out_r, ref_norm(img_r, mean, std), rtol=1e-5, atol=1e-5)

    # Tiny feature map (HW = 49 < 128): channel-major lane-dense layout path.
    img_s = jax.random.uniform(k2, (2, 4, 7, 7), dtype=jnp.float32)
    out_s = jax.block_until_ready(normalization(img_s, mean, std))
    assert jnp.allclose(out_s, ref_norm(img_s, mean, std), rtol=1e-5, atol=1e-5)

    print("KERNEL_OK")
</pallas_src>

<mosaic_0001>
module attributes {stable_mosaic.version = 11 : i64} {
  func.func @_norm_rows_kernel(%arg0: i32, %arg1: i32, %arg2: memref<8x128xf32, #tpu.memory_space<vmem>>, %arg3: memref<8x2xf32, #tpu.memory_space<vmem>>, %arg4: memref<8x128xf32, #tpu.memory_space<vmem>>) attributes {dimension_semantics = [#tpu.dimension_semantics<parallel>, #tpu.dimension_semantics<parallel>], iteration_bounds = array<i64: 1, 2>, scalar_prefetch = 0 : i64, scratch_operands = 0 : i64, tpu.core_type = #tpu.core_type<tc>, window_params = [{transform_indices = @transform_0, window_bounds = array<i64: 8, 128>}, {transform_indices = @transform_1, window_bounds = array<i64: 8, 2>}, {transform_indices = @transform_2, window_bounds = array<i64: 8, 128>}]} {
    %c0 = arith.constant 0 : index
    %c0_0 = arith.constant 0 : index
    %0 = vector.load %arg2[%c0, %c0_0] : memref<8x128xf32, #tpu.memory_space<vmem>>, vector<8x128xf32>
    %c0_1 = arith.constant 0 : index
    %c0_2 = arith.constant 0 : index
    %1 = vector.load %arg3[%c0_1, %c0_2] : memref<8x2xf32, #tpu.memory_space<vmem>>, vector<8x2xf32>
    %2 = vector.extract_strided_slice %1 {offsets = [0, 0], sizes = [8, 1], strides = [1, 1]} : vector<8x2xf32> to vector<8x1xf32>
    %3 = vector.broadcast %2 : vector<8x1xf32> to vector<8x128xf32>
    %4 = arith.mulf %0, %3 : vector<8x128xf32>
    %5 = vector.extract_strided_slice %1 {offsets = [0, 1], sizes = [8, 1], strides = [1, 1]} : vector<8x2xf32> to vector<8x1xf32>
    %6 = vector.broadcast %5 : vector<8x1xf32> to vector<8x128xf32>
    %7 = arith.addf %4, %6 : vector<8x128xf32>
    %c0_3 = arith.constant 0 : index
    %c0_4 = arith.constant 0 : index
    %8 = vector.load %arg4[%c0_3, %c0_4] : memref<8x128xf32, #tpu.memory_space<vmem>>, vector<8x128xf32>
    tpu.vector_store %arg4[%c0_3, %c0_4], %7 {strides = array<i32>} : memref<8x128xf32, #tpu.memory_space<vmem>>, vector<8x128xf32>,
    return
  }
  func.func @transform_0(%arg0: i32, %arg1: i32) -> (i32, i32) {
    %c0_i32 = arith.constant 0 : i32
    return %arg0, %arg1 : i32, i32
  }
  func.func @transform_1(%arg0: i32, %arg1: i32) -> (i32, i32) {
    %c0_i32 = arith.constant 0 : i32
    %c0_i32_0 = arith.constant 0 : i32
    return %arg0, %c0_i32 : i32, i32
  }
  func.func @transform_2(%arg0: i32, %arg1: i32) -> (i32, i32) {
    %c0_i32 = arith.constant 0 : i32
    return %arg0, %arg1 : i32, i32
  }
}

</mosaic_0001>

<bundles_post_ra>
// kernel: tpu_custom_call.1
= control target key start
LH: loop header
LB: loop body
LE: loop exit
PB: predicated region body
PF: predicated region fallthrough
CT: control target
= control target key end

     0   :  { %7 = vsyncpa [#allocation3], 0  ;;  %s659_s0 = inlined_call_operand.hbm [shape: f32[8,256], index: 0, kind: input, shape index: {}]   ;;  %s660_s1 = inlined_call_operand.vmem [shape: f32[8,2], index: 1, kind: input, shape index: {}]   ;;  %s661_s2 = inlined_call_operand.hbm [shape: f32[8,256], index: 2, kind: output, shape index: {}]  }
   0x1   :  { %9 = vsyncpa [#allocation3 + $0x1], 0 }
   0x2   :  { %10 = vsyncpa [#allocation4], 0 }
   0x3   :  { %12 = vsyncpa [#allocation4 + $0x1], 0  ;;  %s536_s9 = smov 0   ;;  %s538_s10 = smov 0  }
   0x4   :  { %s540_s11 = smov 0   ;;  %s542_s12 = smov 0  }
   0x5   :  { %s544_s13 = smov 0   ;;  %s546_s14 = smov 0  }
   0x6 LB: > { %s325_s15 = sadd.s32 4294967295, %s517_s14   ;;  %s326_s16 = sadd.s32 4294967294, %s517_s14   ;;  %s517_s14 = sphi %s546_s14, %s18_s14   ;;  %s513_s13 = sphi %s544_s13, %s670_s13   ;;  %s509_s12 = sphi %s542_s12, %s669_s12   ;;  %s505_s11 = sphi %s540_s11, %s668_s11   ;;  %s501_s10 = sphi %s538_s10, %s667_s10   ;;  %s497_s9 = sphi %s536_s9, %s666_s9  }
   0x7   : > { %s27_s17 = sadd.s32 1, %s513_s13  ;;  %s39_s18 = sadd.s32 1, %s505_s11 }
   0x8   : > { %p28_p0 = scmp.ge.s32.totalorder %s27_s17, 2  ;;  %p46_p1 = scmp.ne.s32.totalorder %s505_s11, %s501_s10 }
   0x9   : > { %p47_p2 = scmp.eq.s32.totalorder %s517_s14, 0  ;;  %p52_p3 = scmp.ne.s32.totalorder %s501_s10, %s497_s9 }
   0xa   : > { %s672_s17 = smov (%p28_p0, %s27_s17), 0  ;;  %p53_p5 = scmp.eq.s32.totalorder %s325_s15, 0 }
   0xb   : > { %p577_p4 = por %p47_p2, %p46_p1  ;;  %s35_s20 = ssub.s32 %s513_s13, %s672_s17 }
   0xc   : > { %p104_p6 = scmp.eq.s32.totalorder %s325_s15, 1  ;;  %p37_p7 = scmp.eq.s32.totalorder %s35_s20, 0 }
   0xd   : > { %p583_p8 = por %p53_p5, %p52_p3  ;;  %p110_p10 = scmp.eq.s32.totalorder %s326_s16, 1 }
   0xe   : > { %p587_p9 = por %p104_p6, %p46_p1  ;;  %p329_p12 = scmp.ge.s32.totalorder %s517_s14, 2 }
   0xf   : > { %s592_s23 = scalar_select %p37_p7, %s505_s11, %s39_s18  }
  0x10   : > { %p594_p11 = por %p110_p10, %p52_p3  ;;  %p351_p13 = scmp.lt.s32.totalorder %s517_s14, 2 }
  0x11   : > { %s137_s25 = sand.u32 1, %s505_s11   ;;  %s331_s27 = sshll.u32 %s513_s13, 3 }
  0x12   : > { %s330_s26 = sshll.u32 %s137_s25, 3  ;;  %s147_s30 = scalar_lea.hbm %s659_s0, %s331_s27 }
  0x13   : > { %s141_s3 = scalar_lea.vmem [#allocation2], %s330_s26  ;;  %s149_s5 = sshll.u32 %s147_s30, 4  ;;  %s150_s5 = int_to_ptr.hbm [resolvable:$true] %s149_s5 }
  0x14   : > { %s151_s4 = sshll.u32 %s141_s3, 4  ;;  %p344_p0 = pnand %p351_p13, %p577_p4  ;;  %s152_s4 = int_to_ptr.vmem [resolvable:$true] %s151_s4 }
  0x15   : > { %p332_p1 = scmp.ge.s32.totalorder %s517_s14, 1  ;;  %p156_p2 = scmp.lt.s32.totalorder %s517_s14, 3 }
  0x16   : > { %s138_s6 = scalar_lea.sflag [#allocation3], %s137_s25 }
  0x17   : > { %346 = dma.hbm_to_vmem [thread:$0]  (!%p344_p0), %s150_s5, 128, %s152_s4, %s138_s6  }
  0x18   : > { %p157_p3 = pnand %p332_p1, %p156_p2 }
  0x19   : > { %s610_s7 = sand.u32 (!%p157_p3), 1, %s501_s10  }
  0x1a   : > { %160 = sbr.rel (%p157_p3) target bundleno = 163 (0xa3), region = 28  ;;  %s333_s8 = sshll.u32 (!%p157_p3), %s610_s7, 3 }
  0x1b   : > { %s163_s15 = scalar_lea.sflag (!%p157_p3), [#allocation3], %s610_s7  ;;  %s166_s16 = scalar_lea.vmem (!%p157_p3), [#allocation2], %s333_s8 }
  0x1f   : > { %488 = dma.done.wait (%p583_p8), %s163_s15, 128  }
  0x20   : > { %490 = vsyncadd (%p583_p8), %s163_s15, 4294967168  ;;  %v519_v0 = vmov 0   ;;  %v197_v1 = vld [vmem:[%s660_s1] sm:$0xff]  ;;  %v520_v2 = vmov 1   ;;  %s336_s20 = sshll.u32 %s509_s12, 3  ;;  %s191_s21 = scalar_lea.vmem [#allocation5], %s333_s8 }
  0x21   : > { %403 = vset.pattern.permute.xlu0 %v519_v0  ;;  %s223_s27 = scalar_lea.hbm %s661_s2, %s336_s20  ;;  %v196_v4 = vld [vmem:[%s166_s16] sm:$0xff]  ;;  %s225_s28 = sshll.u32 %s191_s21, 4  ;;  %s226_s28 = int_to_ptr.vmem [resolvable:$true] %s225_s28 }
  0x22   : > { %200 = vperm.xlu0 %403, %v197_v1   ;;  %s227_s29 = sshll.u32 %s223_s27, 4  ;;  %s211_s30 = scalar_lea.sflag [#allocation4], %s610_s7  ;;  %s228_s29 = int_to_ptr.hbm [resolvable:$true] %s227_s29 }
  0x23   : > { %s449_s3 = sshra.s32 %s228_s29, 4  ;;  %s455_s6 = scalar_lea.hbm %s661_s2, 16  ;;  %s450_s3 = int_to_ptr.hbm [resolvable:$true] %s449_s3 }
  0x24   : > { %s451_s4 = scalar_lea.hbm %s450_s3, 8  ;;  %p456_p7 = scmp.lt.s32.totalorder %s450_s3, %s661_s2 }
  0x25   : > { %p452_p4 = scmp.ne.s32.totalorder %s450_s3, %s451_s4  ;;  %p457_p8 = scmp.lt.s32.totalorder %s455_s6, %s451_s4 }
  0x27   : > { %p453_p5 = pnand %p452_p4, %p587_p9  ;;  %p458_p10 = por %p457_p8, %p456_p7 }
  0x29   : > { %p454_p6 = pneg %p453_p5 }
  0x2a   : > { %404 = vset.pattern.permute.xlu0 %v520_v2 }
  0x2b   : > { %205 = vperm.xlu0 %404, %v197_v1   ;;  %p459_p13 = pnand %p458_p10, %p454_p6 }
  0x94   : > { %v201_v3 = vpop.permute.xlu0 %200 }
  0x95   : > { %v203_v5 = vmul.f32 %v201_v3, %v196_v4 }
  0x9d   : > { %v206_v6 = vpop.permute.xlu0 %205 }
  0x9e   : > { %v208_v7 = vadd.f32 %v206_v6, %v203_v5 }
  0xa0   : > { %209 = vst [vmem:[%s191_s21] sm:$0xff] %v208_v7 }
  0xa1   : > { %462 = shalt.err (!%p459_p13)
}
  0xa2   : > { %341 = dma.vmem_to_hbm [thread:$0]  (%p587_p9), %s226_s28, 128, %s228_s29, %s211_s30  }
  0xa3 PF: > { %s239_s7 = sand.u32 1, %s497_s9   ;;  %p348_p0 = pnand %p329_p12, %p594_p11 }
  0xa4   : > { %s240_s16 = scalar_lea.sflag [#allocation4], %s239_s7 }
  0xa5   : > { %p349_p1 = pneg %p348_p0 }
  0xa7   : > { %492 = dma.done.wait (%p349_p1), %s240_s16, 128  }
  0xa8   : > { %494 = vsyncadd (%p349_p1), %s240_s16, 4294967168  ;;  %s18_s14 = sadd.s32 1, %s517_s14   ;;  %s666_s9 = smov %s501_s10 }
  0xa9   : > { %p15_p2 = scmp.ge.s32.totalorder %s18_s14, 4   ;;  %s667_s10 = smov %s505_s11 }
  0xaa   : > { %s668_s11 = smov %s592_s23  ;;  %s669_s12 = smov %s513_s13 }
  0xab   : > { %s670_s13 = smov %s672_s17  ;;  %17 = sbr.rel (!%p15_p2) target bundleno = 6 (0x6), region = 76 }
  0xb0   :  { %246 = vsyncpa [#allocation3], 1 }
  0xb1   :  { %248 = vsyncpa [#allocation3 + $0x1], 1 }
  0xb2   :  { %249 = vsyncpa [#allocation4], 1 }
  0xb3   :  { %251 = vsyncpa [#allocation4 + $0x1], 1 }

</bundles_post_ra>
